<compile_context>
chip_gen: v6e
topology: v6e:2x2x1
jax: 0.10.0
libtpu: 0.0.40
codegen_flags: <defaults>
</compile_context>

<pallas_src>
import numpy as np
import jax
import jax.numpy as jnp
from jax import lax
from jax.experimental import pallas as pl
from jax.experimental.pallas import tpu as pltpu

LANE = 128
SUBLANE = 8
# x tile 4096*32*4B = 512 KiB + out tile 4096*16*4B = 256 KiB, x2 buffers << VMEM.
MAX_TILE_ROWS = 4096
VMEM_LIMIT = 32 * 1024 * 1024


def _round_up(x, m):
    return ((x + m - 1) // m) * m


def _cdiv(a, b):
    return (a + b - 1) // b


# ----------------------------- row-major linear ----------------------------- #
def _rows_kernel(x_ref, w_ref, b_ref, o_ref):
    # x_ref: (tile_m, dim_in); w_ref: (dim_in, dim_out); b_ref: (1, dim_out)
    acc = jnp.dot(x_ref[...], w_ref[...], preferred_element_type=jnp.float32)
    o_ref[...] = (acc + b_ref[...]).astype(o_ref.dtype)


def rows_linear(x2d, w, b):
    """y = x2d @ w + b for a (M, dim_in) row matrix; output (M, dim_out), unpadded."""
    M, D = x2d.shape
    assert w.shape[0] == D, (w.shape, D)
    dim_out = w.shape[1]

    if M <= SUBLANE:
        tile_m = M                                   # block == full dim -> always legal
    else:
        # >= 2 blocks (v7x dual-TC), multiple of 8, capped to amortize step overhead.
        tile_m = min(MAX_TILE_ROWS, _round_up(_cdiv(M, 2), SUBLANE))
    grid_m = _cdiv(M, tile_m)                        # ragged last block is edge-masked

    b2 = b.reshape(1, dim_out)
    itemsize = np.dtype(x2d.dtype).itemsize
    cost = pl.CostEstimate(
        flops=int(2 * M * D * dim_out), transcendentals=0,
        bytes_accessed=int(itemsize * (M * D + D * dim_out + dim_out + M * dim_out)))

    return pl.pallas_call(
        _rows_kernel,
        out_shape=jax.ShapeDtypeStruct((M, dim_out), x2d.dtype),
        grid=(grid_m,),
        in_specs=[
            pl.BlockSpec((tile_m, D), lambda i: (i, 0)),
            pl.BlockSpec((D, dim_out), lambda i: (0, 0)),
            pl.BlockSpec((1, dim_out), lambda i: (0, 0)),
        ],
        out_specs=pl.BlockSpec((tile_m, dim_out), lambda i: (i, 0)),
        compiler_params=pltpu.CompilerParams(
            dimension_semantics=("parallel",),
            vmem_limit_bytes=VMEM_LIMIT),
        cost_estimate=cost,
    )(x2d, w, b2)


# ---------------------- NCHW linear (transpose folded in) ------------------- #
def _nchw_kernel(x_ref, w_ref, b_ref, o_ref):
    # x_ref: (C, tile_n), w_ref: (C, dim_out) -> contract over C (dim 0 of both),
    # so the NCHW -> NHWC permute never materializes in HBM.
    # TODO(synk): audit the v5e bundle dump for a per-step vxpose of the x tile;
    # only restructure if the vector-extended slot actually binds.
    acc = lax.dot_general(x_ref[...], w_ref[...],
                          dimension_numbers=(((0,), (0,)), ((), ())),
                          preferred_element_type=jnp.float32)
    o_ref[...] = (acc + b_ref[...]).astype(o_ref.dtype)


def nchw_linear(x, w, b):
    """x: (B, C, H, W) NCHW; returns (B, H*W, dim_out) == Linear over the channel axis."""
    B, C, H, W = x.shape
    HW = H * W
    assert w.shape[0] == C, (w.shape, C)
    dim_out = w.shape[1]

    if HW > MAX_TILE_ROWS:
        tile_n = MAX_TILE_ROWS                        # multiple of 128 -> legal lane tiling
    elif B == 1 and HW >= 2 * LANE:
        tile_n = _round_up(_cdiv(HW, 2), LANE)        # keep >= 2 blocks when B can't split
    else:
        tile_n = HW                                   # block == full dim -> always legal
    n_blocks = _cdiv(HW, tile_n)

    x3 = x.reshape(B, C, HW)                          # free collapse; no transpose
    b2 = b.reshape(1, dim_out)
    itemsize = np.dtype(x.dtype).itemsize
    cost = pl.CostEstimate(
        flops=int(2 * B * HW * C * dim_out), transcendentals=0,
        bytes_accessed=int(itemsize * (B * C * HW + C * dim_out + dim_out
                                       + B * HW * dim_out)))

    return pl.pallas_call(
        _nchw_kernel,
        out_shape=jax.ShapeDtypeStruct((B, HW, dim_out), x.dtype),
        grid=(B, n_blocks),
        in_specs=[
            pl.BlockSpec((None, C, tile_n), lambda bi, ni: (bi, 0, ni)),
            pl.BlockSpec((C, dim_out), lambda bi, ni: (0, 0)),
            pl.BlockSpec((1, dim_out), lambda bi, ni: (0, 0)),
        ],
        out_specs=pl.BlockSpec((None, tile_n, dim_out), lambda bi, ni: (bi, ni, 0)),
        compiler_params=pltpu.CompilerParams(
            dimension_semantics=("parallel", "parallel"),
            vmem_limit_bytes=VMEM_LIMIT),
        cost_estimate=cost,
    )(x3, w, b2)


# --------------------------- LinearLayer forward ---------------------------- #
def linear_layer_forward(tokens, weights, biases):
    """Mirrors LinearLayer.forward. tokens is a list; returns a new list."""
    outs = []
    for i, t in enumerate(tokens):
        w, b = weights[i], biases[i]
        dim_out = w.shape[1]
        if t.ndim == 3:
            S, B, D = t.shape
            # The linear is row-wise, so feed rows in (S, B) order via a free
            # reshape (no HBM transpose / slice / pad).  Rows for s == 0 are
            # computed and dropped afterwards (B extra rows, negligible).
            y = rows_linear(t.reshape(S * B, D), w, b)      # (S*B, dim_out)
            y = y.reshape(S, B, dim_out)[1:]                # drop first position
            outs.append(jnp.transpose(y, (1, 0, 2)))        # narrow output permute
        else:
            outs.append(nchw_linear(t, w, b))
    return outs


# ------------------------------ parameter init ------------------------------ #
def init_linear_params(key, dim_in, dim_out, k):
    """nn.Linear default init: U(-1/sqrt(dim_in), 1/sqrt(dim_in)) for W and b."""
    bound = 1.0 / np.sqrt(dim_in)
    weights, biases = [], []
    for _ in range(k):
        kw, kb, key = jax.random.split(key, 3)
        # stored as (dim_in, dim_out) so the kernels do x @ w directly
        weights.append(jax.random.uniform(kw, (dim_in, dim_out), jnp.float32, -bound, bound))
        biases.append(jax.random.uniform(kb, (dim_out,), jnp.float32, -bound, bound))
    return weights, biases


if __name__ == "__main__":
    dim_in, dim_out, k = 32, 16, 3
    key = jax.random.PRNGKey(0)
    k0, k1, k2, kp = jax.random.split(key, 4)

    weights, biases = init_linear_params(kp, dim_in, dim_out, k)

    # token 0: 3D (S, B, dim_in); token 1: 4D NCHW (B, C=dim_in, H, W);
    # token 2: 3D with a row count that exercises the ragged (edge-masked) block.
    tok0 = jax.random.normal(k0, (8, 2, dim_in), jnp.float32)
    tok1 = jax.random.normal(k1, (2, dim_in, 4, 4), jnp.float32)
    tok2 = jax.random.normal(k2, (7, 2, dim_in), jnp.float32)
    tokens = [tok0, tok1, tok2]

    outs = linear_layer_forward(tokens, weights, biases)
    outs = [jax.block_until_ready(o) for o in outs]

    # pure-JAX reference
    def ref3d(t, w, b):
        return jnp.einsum("bsd,do->bso", jnp.transpose(t, (1, 0, 2))[:, 1:, :], w) + b

    def ref4d(t, w, b):
        B, C, H, W = t.shape
        xt = jnp.transpose(t.reshape(B, C, H * W), (0, 2, 1))
        return jnp.einsum("bnd,do->bno", xt, w) + b

    refs = [ref3d(tok0, weights[0], biases[0]),
            ref4d(tok1, weights[1], biases[1]),
            ref3d(tok2, weights[2], biases[2])]

    assert outs[0].shape == (2, 7, dim_out), outs[0].shape
    assert outs[1].shape == (2, 16, dim_out), outs[1].shape
    assert outs[2].shape == (2, 6, dim_out), outs[2].shape
    for o, r in zip(outs, refs):
        np.testing.assert_allclose(np.asarray(o), np.asarray(r), rtol=1e-4, atol=1e-4)

    print("KERNEL_OK")
</pallas_src>

<mosaic_0001>
module attributes {stable_mosaic.version = 11 : i64} {
  func.func @_rows_kernel(%arg0: i32, %arg1: memref<8x32xf32, #tpu.memory_space<vmem>>, %arg2: memref<32x16xf32, #tpu.memory_space<vmem>>, %arg3: memref<1x16xf32, #tpu.memory_space<vmem>>, %arg4: memref<8x16xf32, #tpu.memory_space<vmem>>) attributes {dimension_semantics = [#tpu.dimension_semantics<parallel>], iteration_bounds = array<i64: 2>, scalar_prefetch = 0 : i64, scratch_operands = 0 : i64, tpu.core_type = #tpu.core_type<tc>, window_params = [{transform_indices = @transform_0, window_bounds = array<i64: 8, 32>}, {pipeline_mode = #tpu.pipeline_mode<synchronous>, transform_indices = @transform_1, window_bounds = array<i64: 32, 16>}, {pipeline_mode = #tpu.pipeline_mode<synchronous>, transform_indices = @transform_2, window_bounds = array<i64: 1, 16>}, {transform_indices = @transform_3, window_bounds = array<i64: 8, 16>}]} {
    %c0 = arith.constant 0 : index
    %c0_0 = arith.constant 0 : index
    %0 = vector.load %arg1[%c0, %c0_0] : memref<8x32xf32, #tpu.memory_space<vmem>>, vector<8x32xf32>
    %c0_1 = arith.constant 0 : index
    %c0_2 = arith.constant 0 : index
    %1 = vector.load %arg2[%c0_1, %c0_2] : memref<32x16xf32, #tpu.memory_space<vmem>>, vector<32x16xf32>
    %cst = arith.constant dense<0.000000e+00> : vector<8x16xf32>
    %2 = tpu.matmul %0, %1, %cst {dimension_numbers = #tpu.dot_dimension_numbers<[1], [0], [0], [1], [0, 0, 1, 1], [], []>} : vector<8x32xf32>, vector<32x16xf32>, vector<8x16xf32> -> vector<8x16xf32>
    %c0_3 = arith.constant 0 : index
    %c0_4 = arith.constant 0 : index
    %3 = vector.load %arg3[%c0_3, %c0_4] : memref<1x16xf32, #tpu.memory_space<vmem>>, vector<1x16xf32>
    %4 = vector.broadcast %3 : vector<1x16xf32> to vector<8x16xf32>
    %5 = arith.addf %2, %4 : vector<8x16xf32>
    %c0_5 = arith.constant 0 : index
    %c0_6 = arith.constant 0 : index
    %6 = vector.load %arg4[%c0_5, %c0_6] : memref<8x16xf32, #tpu.memory_space<vmem>>, vector<8x16xf32>
    tpu.vector_store %arg4[%c0_5, %c0_6], %5 {strides = array<i32>} : memref<8x16xf32, #tpu.memory_space<vmem>>, vector<8x16xf32>,
    return
  }
  func.func @transform_0(%arg0: i32) -> (i32, i32) {
    %c0_i32 = arith.constant 0 : i32
    %c0_i32_0 = arith.constant 0 : i32
    return %arg0, %c0_i32 : i32, i32
  }
  func.func @transform_1(%arg0: i32) -> (i32, i32) {
    %c0_i32 = arith.constant 0 : i32
    %c0_i32_0 = arith.constant 0 : i32
    %c0_i32_1 = arith.constant 0 : i32
    return %c0_i32, %c0_i32_0 : i32, i32
  }
  func.func @transform_2(%arg0: i32) -> (i32, i32) {
    %c0_i32 = arith.constant 0 : i32
    %c0_i32_0 = arith.constant 0 : i32
    %c0_i32_1 = arith.constant 0 : i32
    return %c0_i32, %c0_i32_0 : i32, i32
  }
  func.func @transform_3(%arg0: i32) -> (i32, i32) {
    %c0_i32 = arith.constant 0 : i32
    %c0_i32_0 = arith.constant 0 : i32
    return %arg0, %c0_i32 : i32, i32
  }
}

</mosaic_0001>

<bundles_post_ra>
// kernel: tpu_custom_call.1
= control target key start
LH: loop header
LB: loop body
LE: loop exit
PB: predicated region body
PF: predicated region fallthrough
CT: control target
= control target key end

     0   :  { %8 = vsyncpa [#allocation3], 0  ;;  %s589_s0 = inlined_call_operand.vmem [shape: f32[16,32], index: 0, kind: input, shape index: {}]   ;;  %s590_s1 = inlined_call_operand.vmem [shape: f32[32,16], index: 1, kind: input, shape index: {}]   ;;  %s591_s2 = inlined_call_operand.vmem [shape: f32[1,16], index: 2, kind: input, shape index: {}]   ;;  %s592_s3 = inlined_call_operand.hbm [shape: f32[16,16], index: 3, kind: output, shape index: {}]  }
   0x1   :  { %10 = vsyncpa [#allocation3 + $0x1], 0  ;;  %s481_s12 = smov 0   ;;  %s483_s13 = smov 0  }
   0x2   :  { %s485_s14 = smov 0   ;;  %s487_s15 = smov 0  }
   0x3 LB: > { %s502_s16 = sadd.s32 4294967295, %s456_s15   ;;  %s327_s17 = sadd.s32 4294967294, %s456_s15   ;;  %s456_s15 = sphi %s487_s15, %s598_s15   ;;  %s452_s14 = sphi %s485_s14, %s597_s14   ;;  %s448_s13 = sphi %s483_s13, %s596_s13   ;;  %s444_s12 = sphi %s481_s12, %s595_s12  }
   0x4   : > { %s506_s18 = sadd.s32 1, %s456_s15   ;;  %s91_s19 = sadd.s32 1, %s452_s14 }
   0x5   : > { %s88_s20 = ssub.s32 %s456_s15, %s506_s18  ;;  %p101_p0 = scmp.ne.s32.totalorder %s452_s14, %s448_s13 }
   0x6   : > { %p89_p1 = scmp.eq.s32.totalorder %s88_s20, 0  ;;  %p102_p2 = scmp.eq.s32.totalorder %s502_s16, 1 }
   0x7   : > { %p107_p3 = scmp.ne.s32.totalorder %s448_s13, %s444_s12  ;;  %p108_p4 = scmp.eq.s32.totalorder %s327_s17, 1 }
   0x8   : > { %s517_s21 = scalar_select %p89_p1, %s452_s14, %s91_s19  }
   0x9   : > { %p519_p5 = por %p102_p2, %p101_p0  ;;  %p523_p6 = por %p108_p4, %p107_p3 }
   0xa   : > { %p330_p7 = scmp.ge.s32.totalorder %s456_s15, 1  ;;  %p139_p8 = scmp.lt.s32.totalorder %s456_s15, 3 }
   0xc   : > { %p140_p9 = pnand %p330_p7, %p139_p8 }
   0xd   : > { %p162_p10 = scmp.lt.s32.totalorder (!%p140_p9), %s502_s16, 1  ;;  %s159_s10 = sand.u32 (!%p140_p9), 1, %s448_s13  }
   0xe   : > { %143 = sbr.rel (%p140_p9) target bundleno = 236 (0xec), region = 32  ;;  %s331_s11 = sshll.u32 (!%p140_p9), %s159_s10, 3 }
   0xf   : > { %s336_s20 = sshll.u32 (!%p140_p9), %s502_s16, 7  ;;  %s161_s24 = scalar_lea.vmem (!%p140_p9), [#allocation2], %s331_s11 }
  0x10   : > { %s268_s25 = sshll.u32 (!%p140_p9), %s161_s24, 4  ;;  %s255_s29 = scalar_lea.sflag (!%p140_p9), [#allocation3], %s159_s10  ;;  %s269_s25 = int_to_ptr.vmem [resolvable:$true] %s268_s25 }
  0x11   : > { %s396_s30 = scalar_lea.vmem (!%p140_p9), %s269_s25, 128 }
  0x12   : > { %p397_p11 = scmp.ne.s32.totalorder (!%p140_p9), %s269_s25, %s396_s30 }
  0x13   : > { %v170_v0 = vld [vmem:[%s590_s1 + $0x18] sm:$0xff]  ;;  %v458_v1 = vmov 0.0   ;;  %v169_v2 = vld [vmem:[%s590_s1 + $0x10] sm:$0xff]  ;;  %vm459_vm0 = vmmov 0   ;;  %s163_s28 = scalar_select %p162_p10, %s502_s16, 1  ;;  %v168_v3 = vld [vmem:[%s590_s1 + $0x8] sm:$0xff] }
  0x14   : > { %344 = vmatprep.subr.mxu0 %v458_v1  ;;  %352 = vmatprep.mubr.msk.f32.mxu0 %vm459_vm0, %v458_v1  ;;  %v167_v4 = vld [vmem:[%s590_s1] sm:$0xff]  ;;  %vm178_vm1 = vcmask 261120   ;;  %vm252_vm2 = vcmask 130048   ;;  %p398_p12 = pnand %p397_p11, %p519_p5  ;;  %s460_s16 = smov [#allocation2]  }
  0x15   : > { %345 = vmatpush3.msra.mxu0 %v170_v0  ;;  %s332_s4 = sshll.u32 %s163_s28, 3  ;;  %v333_v6 = vld [vmem:[%s591_s2] ss:$0 sm:$0xff]  ;;  %s554_s28 = scalar_lea.hbm %s592_s3, %s336_s20 }
  0x16   : > { %346 = vmatprep.subr.mxu0 %v458_v1  ;;  %s165_s9 = scalar_lea.vmem %s589_s0, %s332_s4  ;;  %p399_p13 = pneg %p398_p12 }
  0x17   : > { %347 = vmatpush3.msra.mxu0 %v169_v2  ;;  %v166_v5 = vld [vmem:[%s165_s9] sm:$0xff]  ;;  %s400_s4 = sshll.u32 %s460_s16, 4  ;;  %s401_s4 = int_to_ptr.vmem [resolvable:$false] %s400_s4 }
  0x18   : > { %348 = vmatprep.subr.mxu0 %v458_v1  ;;  %s402_s5 = scalar_lea.vmem %s401_s4, 256  ;;  %p403_p0 = scmp.lt.s32.totalorder %s269_s25, %s401_s4 }
  0x19   : > { %349 = vmatpush3.msra.mxu0 %v168_v3  ;;  %p404_p1 = scmp.lt.s32.totalorder %s402_s5, %s396_s30 }
  0x1a   : > { %350 = vmatprep.subr.mxu0 %v458_v1 }
  0x1b   : > { %351 = vmatpush3.msra.mxu0 %v167_v4  ;;  %p405_p2 = por %p404_p1, %p403_p0 }
  0x1c   : > { %353 = vmatmul.mubr.msk.f32.vlgmr.msra.gmra.mxu0 %vm178_vm1, %v166_v5 }
  0x1d   : > { %p406_p3 = pnand %p405_p2, %p399_p13 }
  0xdc   : > { %v248_v7 = vpop.f32.mrf.mxu0 }
  0xdd   : > { %v249_v8 = vadd.f32 %v333_v6, %v248_v7 }
  0xde   : > { %v354_v9 = vpop.f32.mrf.mxu0 }
  0xdf   : > { %253 = vst.msk [vmem:[%s161_s24] sm:$0xff] %vm252_vm2, %v249_v8 }
  0xe0   : > { %409 = shalt.err (!%p406_p3)
}
  0xe1   : > { %s410_s6 = scalar_lea.hbm %s554_s28, 128  ;;  %s414_s9 = scalar_lea.hbm %s592_s3, 256 }
  0xe2   : > { %p411_p4 = scmp.ne.s32.totalorder %s554_s28, %s410_s6  ;;  %p415_p9 = scmp.lt.s32.totalorder %s554_s28, %s592_s3 }
  0xe3   : > { %p416_p10 = scmp.lt.s32.totalorder %s414_s9, %s410_s6 }
  0xe4   : > { %p412_p7 = pnand %p411_p4, %p519_p5 }
  0xe5   : > { %p417_p11 = por %p416_p10, %p415_p9 }
  0xe6   : > { %p413_p8 = pneg %p412_p7 }
  0xe8   : > { %p418_p12 = pnand %p417_p11, %p413_p8 }
  0xea   : > { %421 = shalt.err (!%p418_p12)
}
  0xeb   : > { %355 = dma.vmem_to_hbm [thread:$0]  (%p519_p5), %s269_s25, 128, %s554_s28, %s255_s29  }
  0xec PF: > { %p361_p13 = scmp.ge.s32.totalorder %s456_s15, 2  ;;  %s280_s17 = sand.u32 1, %s444_s12  }
  0xed   : > { %s281_s19 = scalar_lea.sflag [#allocation3], %s280_s17 }
  0xee   : > { %p358_p0 = pnand %p361_p13, %p523_p6 }
  0xf0   : > { %p359_p1 = pneg %p358_p0 }
  0xf2   : > { %439 = dma.done.wait (%p359_p1), %s281_s19, 128  }
  0xf3   : > { %441 = vsyncadd (%p359_p1), %s281_s19, 4294967168  ;;  %p13_p2 = scmp.ge.s32.totalorder %s506_s18, 4   ;;  %s595_s12 = smov %s448_s13 }
  0xf4   : > { %s596_s13 = smov %s452_s14  ;;  %s597_s14 = smov %s517_s21 }
  0xf5   : > { %s598_s15 = smov %s506_s18  ;;  %15 = sbr.rel (!%p13_p2) target bundleno = 3 (0x3), region = 67 }
  0xfa   :  { %286 = vsyncpa [#allocation3], 1 }
  0xfb   :  { %288 = vsyncpa [#allocation3 + $0x1], 1 }

</bundles_post_ra>
